<compile_context>
chip_gen: v7x
topology: tpu7x:2x2x1
jax: 0.10.0
libtpu: 0.0.40
codegen_flags: <defaults>
</compile_context>

<pallas_src>
import math
from functools import partial

import jax
import jax.numpy as jnp
from jax.experimental import pallas as pl
from jax.experimental.pallas import tpu as pltpu


def _round_up(x, m):
    return ((x + m - 1) // m) * m


def _choose_tile_b(B, max_tile=128):
    """Batch tile: multiple of 8, <= 128, minimizing padding waste (ties -> larger).
    Capping at 128 keeps >= 2 grid steps once B_pad >= 256 so v7x can shard the
    batch over both TensorCores."""
    best_tb, best_pad = 8, None
    for tb in range(8, max_tile + 1, 8):
        pad = _round_up(B, tb) - B
        if best_pad is None or pad < best_pad or (pad == best_pad and tb > best_tb):
            best_tb, best_pad = tb, pad
    return best_tb


# ---------------------------------------------------------------------------
# Pallas kernel:  out = swish(one_hot(t) @ W_eff + b1) @ W2 + b2
#                 with W_eff = sinusoidal_table @ W1   (folded at setup, exact)
# ---------------------------------------------------------------------------
def time_embedding_kernel(t_ref, w_eff_ref, w2_ref, b_ref, out_ref):
    # ---- fused embedding gather + Linear-1 as one bf16 MXU matmul ----
    t_blk = t_ref[...]                                          # [TILE_B, 1] int32
    tile_b = t_blk.shape[0]
    T = w_eff_ref.shape[0]
    iota = jax.lax.broadcasted_iota(jnp.int32, (tile_b, T), 1)  # [TILE_B, T]
    onehot = (t_blk == iota).astype(jnp.bfloat16)               # 0/1 exact in bf16

    b = b_ref[...]                                              # [2, dim_p] f32
    b1 = b[0:1, :]
    b2 = b[1:2, :]

    h = jnp.dot(onehot, w_eff_ref[...],
                preferred_element_type=jnp.float32) + b1        # [TILE_B, dim_p] f32

    # ---- Swish in f32 (v5e has no bf16 VPU/EUP). ----
    # sigmoid(x) = 0.5 * tanh(0.5 x) + 0.5 : exact, one EUP op per element.
    h = h * (0.5 * jnp.tanh(0.5 * h) + 0.5)

    # ---- Linear 2: bf16 MXU operands, f32 accumulation, f32 bias add ----
    out = jnp.dot(h.astype(jnp.bfloat16), w2_ref[...],
                  preferred_element_type=jnp.float32) + b2      # [TILE_B, dim_p] f32
    out_ref[...] = out.astype(out_ref.dtype)


def _time_embedding_mlp(t_2d, w_eff, w2, b_packed, *, tile_b):
    """t_2d: [B_pad, 1] int32, w_eff: [T, dim_p] bf16, w2: [dim_p, dim_p] bf16,
    b_packed: [2, dim_p] f32.  Returns [B_pad, dim_p] f32."""
    B_pad = t_2d.shape[0]
    T, dim_p = w_eff.shape
    assert B_pad % tile_b == 0
    grid = (B_pad // tile_b,)

    # Constant-index (resident) inputs: a second pipeline buffer is useless.
    resident = dict(pipeline_mode=pl.Buffered(1))

    return pl.pallas_call(
        time_embedding_kernel,
        out_shape=jax.ShapeDtypeStruct((B_pad, dim_p), jnp.float32),
        grid=grid,
        in_specs=[
            pl.BlockSpec((tile_b, 1), lambda i: (i, 0)),                 # t (tiled)
            pl.BlockSpec((T, dim_p), lambda i: (0, 0), **resident),      # W_eff
            pl.BlockSpec((dim_p, dim_p), lambda i: (0, 0), **resident),  # W2
            pl.BlockSpec((2, dim_p), lambda i: (0, 0), **resident),      # b1/b2
        ],
        out_specs=pl.BlockSpec((tile_b, dim_p), lambda i: (i, 0)),
        compiler_params=pltpu.CompilerParams(
            dimension_semantics=("parallel",),      # shard grid across v7x's 2 TCs
            vmem_limit_bytes=32 * 1024 * 1024,      # safe on v5e/v6e (128 MiB) and v7x (64 MiB)
        ),
    )(t_2d, w_eff, w2, b_packed)


@partial(jax.jit, static_argnames=("dim", "tile_b"))
def _forward(t, w_eff, w2, b_packed, *, dim, tile_b):
    """pad(t) + pallas_call + unpad slice fused into one XLA dispatch."""
    B = t.shape[0]
    B_pad = _round_up(B, tile_b)
    # Padded rows gather table row 0 and run the full MLP; they are sliced off below.
    t_p = jnp.pad(t.astype(jnp.int32), (0, B_pad - B)).reshape(B_pad, 1)
    out = _time_embedding_mlp(t_p, w_eff, w2, b_packed, tile_b=tile_b)
    return out[:B, :dim]


# ---------------------------------------------------------------------------
# Module setup (plain JAX glue): sinusoidal table + xavier-uniform linears
# ---------------------------------------------------------------------------
def make_sinusoidal_table(T, d_model):
    assert d_model % 2 == 0
    freqs = jnp.arange(0, d_model, 2, dtype=jnp.float32) / d_model * math.log(10000.0)
    freqs = jnp.exp(-freqs).reshape(1, -1)                   # [1, d_model//2]
    pos = jnp.arange(T, dtype=jnp.float32).reshape(T, 1)     # [T, 1]
    angles = pos * freqs                                     # [T, d_model//2]
    # stack([sin, cos], axis=-1).view(T, d_model) -> interleaved sin/cos
    return jnp.stack([jnp.sin(angles), jnp.cos(angles)], axis=-1).reshape(T, d_model)


def xavier_uniform(key, fan_in, fan_out):
    # torch init.xavier_uniform_ on weight of shape (out, in); we store the
    # transpose (in, out) so forward is x @ W.  Bound is identical.
    bound = math.sqrt(6.0 / (fan_in + fan_out))
    return jax.random.uniform(key, (fan_in, fan_out), jnp.float32, -bound, bound)


class TimeEmbeddingPallas:
    def __init__(self, T, d_model, dim, key):
        assert d_model % 2 == 0
        self.T, self.d_model, self.dim = T, d_model, dim

        tab = make_sinusoidal_table(T, d_model)               # [T, d_model] f32
        k1, k2 = jax.random.split(key)
        w1 = xavier_uniform(k1, d_model, dim)                 # [d_model, dim]
        w2 = xavier_uniform(k2, dim, dim)                     # [dim, dim]
        b1 = jnp.zeros((dim,), jnp.float32)
        b2 = jnp.zeros((dim,), jnp.float32)

        # f32 copies for the reference path
        self._tab_f32, self._w1_f32, self._w2_f32 = tab, w1, w2
        self._b1_f32, self._b2_f32 = b1, b2

        # ---- fold the fixed table into Linear-1 (exact; table is non-learned) ----
        # Computed in f32, then stored bf16, lane-padded to a multiple of 128.
        dim_p = _round_up(dim, 128)
        self.dim_p = dim_p

        w_eff = tab @ w1                                      # [T, dim] f32
        w_eff = jnp.pad(w_eff, ((0, 0), (0, dim_p - dim)))
        self.w_eff_bf16 = w_eff.astype(jnp.bfloat16)          # [T, dim_p] bf16

        w2_p = jnp.pad(w2, ((0, dim_p - dim), (0, dim_p - dim)))
        self.w2_bf16 = w2_p.astype(jnp.bfloat16)              # [dim_p, dim_p] bf16

        b1_p = jnp.pad(b1, (0, dim_p - dim))
        b2_p = jnp.pad(b2, (0, dim_p - dim))
        self.b_packed = jnp.stack([b1_p, b2_p], axis=0)       # [2, dim_p] f32

    def __call__(self, t):
        tile_b = _choose_tile_b(t.shape[0])
        return _forward(t, self.w_eff_bf16, self.w2_bf16, self.b_packed,
                        dim=self.dim, tile_b=tile_b)

    def reference(self, t):
        emb = jnp.take(self._tab_f32, t, axis=0)
        h = emb @ self._w1_f32 + self._b1_f32
        h = h * jax.nn.sigmoid(h)
        return h @ self._w2_f32 + self._b2_f32


if __name__ == "__main__":
    T, d_model, dim = 16, 32, 64
    B = 8

    key = jax.random.PRNGKey(0)
    k_params, k_t = jax.random.split(key)

    module = TimeEmbeddingPallas(T, d_model, dim, k_params)
    t = jax.random.randint(k_t, (B,), 0, T, dtype=jnp.int32)

    out = jax.block_until_ready(module(t))
    ref = module.reference(t)

    assert out.shape == (B, dim)
    # Tolerance loosened vs. pure-f32 because the MXU operands (one-hot/W_eff, h/W2)
    # are bf16 (f32 accumulation); the sigmoid is now exact (single tanh).
    assert jnp.allclose(out, ref, atol=5e-2, rtol=5e-2), "mismatch vs JAX reference"

    print("KERNEL_OK")
</pallas_src>

<mosaic_0001>
module attributes {stable_mosaic.version = 11 : i64} {
  func.func @time_embedding_kernel(%arg0: i32, %arg1: memref<8x1xi32, #tpu.memory_space<vmem>>, %arg2: memref<16x128xbf16, #tpu.memory_space<vmem>>, %arg3: memref<128x128xbf16, #tpu.memory_space<vmem>>, %arg4: memref<2x128xf32, #tpu.memory_space<vmem>>, %arg5: memref<8x128xf32, #tpu.memory_space<vmem>>) attributes {dimension_semantics = [#tpu.dimension_semantics<parallel>], iteration_bounds = array<i64: 1>, scalar_prefetch = 0 : i64, scratch_operands = 0 : i64, tpu.core_type = #tpu.core_type<tc>, window_params = [{transform_indices = @transform_0, window_bounds = array<i64: 8, 1>}, {pipeline_mode = #tpu.pipeline_mode<synchronous>, transform_indices = @transform_1, window_bounds = array<i64: 16, 128>}, {pipeline_mode = #tpu.pipeline_mode<synchronous>, transform_indices = @transform_2, window_bounds = array<i64: 128, 128>}, {pipeline_mode = #tpu.pipeline_mode<synchronous>, transform_indices = @transform_3, window_bounds = array<i64: 2, 128>}, {transform_indices = @transform_4, window_bounds = array<i64: 8, 128>}]} {
    %c0 = arith.constant 0 : index
    %c0_0 = arith.constant 0 : index
    %0 = vector.load %arg1[%c0, %c0_0] : memref<8x1xi32, #tpu.memory_space<vmem>>, vector<8x1xi32>
    %1 = tpu.iota {dimensions = array<i32: 1>} : vector<8x16xi32>
    %2 = vector.broadcast %0 : vector<8x1xi32> to vector<8x16xi32>
    %3 = arith.cmpi eq, %2, %1 : vector<8x16xi32>
    %4 = arith.extui %3 : vector<8x16xi1> to vector<8x16xi32>
    %5 = arith.sitofp %4 : vector<8x16xi32> to vector<8x16xf32>
    %6 = arith.truncf %5 : vector<8x16xf32> to vector<8x16xbf16>
    %c0_1 = arith.constant 0 : index
    %c0_2 = arith.constant 0 : index
    %7 = vector.load %arg4[%c0_1, %c0_2] : memref<2x128xf32, #tpu.memory_space<vmem>>, vector<2x128xf32>
    %8 = vector.extract_strided_slice %7 {offsets = [0, 0], sizes = [1, 128], strides = [1, 1]} : vector<2x128xf32> to vector<1x128xf32>
    %9 = vector.extract_strided_slice %7 {offsets = [1, 0], sizes = [1, 128], strides = [1, 1]} : vector<2x128xf32> to vector<1x128xf32>
    %c0_3 = arith.constant 0 : index
    %c0_4 = arith.constant 0 : index
    %10 = vector.load %arg2[%c0_3, %c0_4] : memref<16x128xbf16, #tpu.memory_space<vmem>>, vector<16x128xbf16>
    %cst = arith.constant dense<0.000000e+00> : vector<8x128xf32>
    %11 = tpu.matmul %6, %10, %cst {dimension_numbers = #tpu.dot_dimension_numbers<[1], [0], [0], [1], [0, 0, 1, 1], [], []>} : vector<8x16xbf16>, vector<16x128xbf16>, vector<8x128xf32> -> vector<8x128xf32>
    %12 = vector.broadcast %8 : vector<1x128xf32> to vector<8x128xf32>
    %13 = arith.addf %11, %12 : vector<8x128xf32>
    %cst_5 = arith.constant 5.000000e-01 : f32
    %14 = vector.broadcast %cst_5 : f32 to vector<8x128xf32>
    %15 = arith.mulf %14, %13 : vector<8x128xf32>
    %16 = math.tanh %15 : vector<8x128xf32>
    %cst_6 = arith.constant 5.000000e-01 : f32
    %17 = vector.broadcast %cst_6 : f32 to vector<8x128xf32>
    %18 = arith.mulf %17, %16 : vector<8x128xf32>
    %cst_7 = arith.constant 5.000000e-01 : f32
    %19 = vector.broadcast %cst_7 : f32 to vector<8x128xf32>
    %20 = arith.addf %18, %19 : vector<8x128xf32>
    %21 = arith.mulf %13, %20 : vector<8x128xf32>
    %22 = arith.truncf %21 : vector<8x128xf32> to vector<8x128xbf16>
    %c0_8 = arith.constant 0 : index
    %c0_9 = arith.constant 0 : index
    %23 = vector.load %arg3[%c0_8, %c0_9] : memref<128x128xbf16, #tpu.memory_space<vmem>>, vector<128x128xbf16>
    %cst_10 = arith.constant dense<0.000000e+00> : vector<8x128xf32>
    %24 = tpu.matmul %22, %23, %cst_10 {dimension_numbers = #tpu.dot_dimension_numbers<[1], [0], [0], [1], [0, 0, 1, 1], [], []>} : vector<8x128xbf16>, vector<128x128xbf16>, vector<8x128xf32> -> vector<8x128xf32>
    %25 = vector.broadcast %9 : vector<1x128xf32> to vector<8x128xf32>
    %26 = arith.addf %24, %25 : vector<8x128xf32>
    %c0_11 = arith.constant 0 : index
    %c0_12 = arith.constant 0 : index
    %27 = vector.load %arg5[%c0_11, %c0_12] : memref<8x128xf32, #tpu.memory_space<vmem>>, vector<8x128xf32>
    tpu.vector_store %arg5[%c0_11, %c0_12], %26 {strides = array<i32>} : memref<8x128xf32, #tpu.memory_space<vmem>>, vector<8x128xf32>,
    return
  }
  func.func @transform_0(%arg0: i32) -> (i32, i32) {
    %c0_i32 = arith.constant 0 : i32
    %c0_i32_0 = arith.constant 0 : i32
    return %arg0, %c0_i32 : i32, i32
  }
  func.func @transform_1(%arg0: i32) -> (i32, i32) {
    %c0_i32 = arith.constant 0 : i32
    %c0_i32_0 = arith.constant 0 : i32
    %c0_i32_1 = arith.constant 0 : i32
    return %c0_i32, %c0_i32_0 : i32, i32
  }
  func.func @transform_2(%arg0: i32) -> (i32, i32) {
    %c0_i32 = arith.constant 0 : i32
    %c0_i32_0 = arith.constant 0 : i32
    %c0_i32_1 = arith.constant 0 : i32
    return %c0_i32, %c0_i32_0 : i32, i32
  }
  func.func @transform_3(%arg0: i32) -> (i32, i32) {
    %c0_i32 = arith.constant 0 : i32
    %c0_i32_0 = arith.constant 0 : i32
    %c0_i32_1 = arith.constant 0 : i32
    return %c0_i32, %c0_i32_0 : i32, i32
  }
  func.func @transform_4(%arg0: i32) -> (i32, i32) {
    %c0_i32 = arith.constant 0 : i32
    %c0_i32_0 = arith.constant 0 : i32
    return %arg0, %c0_i32 : i32, i32
  }
}

</mosaic_0001>

<bundles_post_ra>
// kernel: _forward.1
= control target key start
LH: loop header
LB: loop body
LE: loop exit
PB: predicated region body
PF: predicated region fallthrough
CT: control target
= control target key end

     0   :  { %9 = vsyncpa [#allocation3], 0  ;;  %s410_s0 = inlined_call_operand.vmem [shape: s32[8,1], index: 0, kind: input, shape index: {}]   ;;  %s411_s1 = inlined_call_operand.vmem [shape: bf16[16,128], index: 1, kind: input, shape index: {}]   ;;  %s412_s2 = inlined_call_operand.hbm [shape: bf16[128,128], index: 2, kind: input, shape index: {}]   ;;  %s413_s3 = inlined_call_operand.vmem [shape: f32[2,128], index: 3, kind: input, shape index: {}]   ;;  %s414_s4 = inlined_call_operand.hbm [shape: f32[8,128], index: 4, kind: output, shape index: {}]  }
   0x1   :  { %10 = vsyncpa [#allocation4], 0  ;;  %s345_s15 = smov [#allocation2]   ;;  %s297_s19 = scalar_lea.hbm %s412_s2, 1024 }
   0x2   :  { %s20_s16 = sshll.u32 %s345_s15, 4  ;;  %p298_p0 = scmp.ne.s32.totalorder %s412_s2, %s297_s19  ;;  %s21_s16 = int_to_ptr.vmem [resolvable:$true] %s20_s16 }
   0x3   :  { %p301_p1 = scmp.lt.u32.totalorder %s297_s19, %s412_s2 }
   0x5   :  { %p303_p2 = pnand %p301_p1, %p298_p0 }
   0x7   :  { %306 = shalt.err (!%p303_p2)
}
   0x8   :  { %s307_s24 = scalar_lea.vmem %s21_s16, 1024  ;;  %p312_p4 = scmp.lt.s32.totalorder %s21_s16, %s21_s16 }
   0x9   :  { %p308_p3 = scmp.ne.s32.totalorder %s21_s16, %s307_s24  ;;  %p313_p5 = scmp.lt.s32.totalorder %s307_s24, %s307_s24 }
   0xb   :  { %p314_p6 = por %p313_p5, %p312_p4 }
   0xd   :  { %p315_p7 = pnand %p314_p6, %p308_p3 }
   0xf   :  { %318 = shalt.err (!%p315_p7)
}
  0x10   :  { %s346_s25 = smov 64   ;;  %s347_s26 = smov 4  }
  0x11   :  { %26 = dma.hbm_to_vmem [thread:$0]  %s412_s2, 1024, %s21_s16, [#allocation3], %s346_s25, %s346_s25, %s347_s26  }
  0x12   :  { %341 = dma.done.wait [#allocation3], 1024  }
  0x13   :  { %342 = vsyncadd [#allocation3], 4294966272  ;;  %v348_v0 = vmov 0   ;;  %v349_v1 = vmov 0.0   ;;  %v33_v2 = vld [vmem:[%s410_s0] sm:$0xff]  ;;  %vm350_vm0 = vmmov 0   ;;  %v34_v6 = vlaneseq }
  0x14   :  { %285 = vset.pattern.permute.xlu0 %v348_v0  ;;  %252 = vmatprep.subr.bf16.mxu0 %v349_v1  ;;  %v286_v3 = vld [vmem:[%s411_s1] sm:$0xff]   ;;  %v288_v5 = vld [vmem:[#allocation2 + $0x8] sm:$0xff]   ;;  %vm56_vm2 = vcmask 130048   ;;  %v289_v11 = vld [vmem:[#allocation2 + $0x10] sm:$0xff]   ;;  %s351_s2 = smov [#allocation5]  }
  0x15   :  { %258 = vmatprep.subr.bf16.mxu1 %v349_v1  ;;  %37 = vperm.xlu0 %285, %v33_v2   ;;  %v287_v4 = vld [vmem:[#allocation2] sm:$0xff]   ;;  %v35_v7 = vand.u32 127, %v34_v6  ;;  %v290_v12 = vld [vmem:[#allocation2 + $0x18] sm:$0xff]   ;;  %v292_v14 = vld [vmem:[#allocation2 + $0x28] sm:$0xff]   ;;  %v47_v17 = vshrl.u32 %v34_v6, 7  ;;  %s221_s7 = sshll.u32 %s351_s2, 4  ;;  %s222_s7 = int_to_ptr.vmem [resolvable:$true] %s221_s7 }
  0x16   :  { %253 = vmatpush3.bf16.msra.mxu0 %v286_v3  ;;  %254 = vmatprep.mubr.msk.bf16.mxu0 %vm350_vm0, %v349_v1  ;;  %v291_v13 = vld [vmem:[#allocation2 + $0x20] sm:$0xff]   ;;  %v293_v15 = vld [vmem:[#allocation2 + $0x30] sm:$0xff]   ;;  %v294_v16 = vld [vmem:[#allocation2 + $0x38] sm:$0xff]   ;;  %p324_p9 = scmp.lt.s32.totalorder %s222_s7, %s222_s7 }
  0x17   :  { %274 = vmatprep.mubr.msk.bf16.mxu1 %vm350_vm0, %v349_v1  ;;  %259 = vmatpush3.bf16.msra.mxu1 %v287_v4  ;;  %v48_v18 = vsub.s32 0, %v47_v17  ;;  %v43_v19 = vld [vmem:[%s413_s3] sm:$0x3]  ;;  %v124_v32 = vsub.s32 1, %v47_v17  ;;  %s319_s3 = scalar_lea.vmem %s222_s7, 128 }
  0x18   :  { %260 = vmatprep.subr.bf16.mxu1 %v349_v1  ;;  %p320_p8 = scmp.ne.s32.totalorder %s222_s7, %s319_s3  ;;  %p325_p10 = scmp.lt.s32.totalorder %s319_s3, %s319_s3 }
  0x19   :  { %v49_v20 = vrot.slane %v43_v19, %v48_v18  ;;  %v125_v33 = vrot.slane %v43_v19, %v124_v32 }
  0x1a   :  { %p326_p11 = por %p325_p10, %p324_p9 }
  0x1b   :  { %261 = vmatpush3.bf16.msra.mxu1 %v288_v5 }
  0x1c   :  { %262 = vmatprep.subr.bf16.mxu1 %v349_v1  ;;  %p327_p12 = pnand %p326_p11, %p320_p8 }
  0x1f   :  { %263 = vmatpush3.bf16.msra.mxu1 %v289_v11 }
  0x20   :  { %264 = vmatprep.subr.bf16.mxu1 %v349_v1 }
  0x23   :  { %265 = vmatpush3.bf16.msra.mxu1 %v290_v12 }
  0x24   :  { %266 = vmatprep.subr.bf16.mxu1 %v349_v1 }
  0x27   :  { %267 = vmatpush3.bf16.msra.mxu1 %v291_v13 }
  0x28   :  { %268 = vmatprep.subr.bf16.mxu1 %v349_v1 }
  0x2b   :  { %269 = vmatpush3.bf16.msra.mxu1 %v292_v14 }
  0x2c   :  { %270 = vmatprep.subr.bf16.mxu1 %v349_v1 }
  0x2f   :  { %271 = vmatpush3.bf16.msra.mxu1 %v293_v15 }
  0x30   :  { %272 = vmatprep.subr.bf16.mxu1 %v349_v1 }
  0x33   :  { %273 = vmatpush3.bf16.msra.mxu1 %v294_v16 }
  0x94   :  { %v38_v8 = vpop.permute.xlu0 %37 }
  0x95   :  { %vm39_vm1 = vcmp.eq.s32.totalorder %v38_v8, %v35_v7 }
  0x96   :  { %v230_v9 = vsel %vm39_vm1, 1.0, %v349_v1 }
  0x97   :  { %v42_v10 = vpack.c.bf16 %v230_v9, %v230_v9 }
  0x99   :  { %255 = vmatmul.mubr.msk.bf16.vlgmr.msra.gmra.mrb[0].mxu0 %vm56_vm2, %v42_v10 }
 0x16c   :  { %v94_v21 = vpop.f32.mrb[0].mxu0 }
 0x16d   :  { %v95_v22 = vadd.f32 %v94_v21, %v49_v20  ;;  %v256_v23 = vpop.f32.mrb[1].mxu0 }
 0x16e   :  { %v97_v24 = vpop.f32.mrb[2].mxu0 }
 0x16f   :  { %v100_v25 = vmul.f32 0.5, %v95_v22  ;;  %v257_v26 = vpop.f32.mrb[3].mxu0 }
 0x171   :  { %295 = vtanh.f32 %v100_v25 }
 0x17b   :  { %v296_v27 = vpop.eup %295 }
 0x17c   :  { %v102_v28 = vmul.f32 0.5, %v296_v27 }
 0x17e   :  { %v103_v29 = vadd.f32 0.5, %v102_v28 }
 0x180   :  { %v104_v30 = vmul.f32 %v103_v29, %v95_v22 }
 0x182   :  { %v105_v31 = vpack.c.bf16 %v104_v30, %v104_v30 }
 0x184   :  { %275 = vmatmul.mubr.bf16.vlgmr.msra.gmra.mrb[0].mxu1 %v105_v31 }
 0x257   :  { %v208_v34 = vpop.f32.mrb[0].mxu1 }
 0x258   :  { %v209_v35 = vadd.f32 %v208_v34, %v125_v33  ;;  %v276_v36 = vpop.f32.mrb[1].mxu1 }
 0x259   :  { %v211_v37 = vpop.f32.mrb[2].mxu1 }
 0x25a   :  { %214 = vst [vmem:[#allocation5] sm:$0xff] %v209_v35  ;;  %v277_v38 = vpop.f32.mrb[3].mxu1 }
 0x25b   :  { %330 = shalt.err (!%p327_p12)
}
 0x25c   :  { %s331_s10 = scalar_lea.hbm %s414_s4, 128 }
 0x25d   :  { %p332_p13 = scmp.ne.s32.totalorder %s414_s4, %s331_s10  ;;  %p335_p0 = scmp.lt.u32.totalorder %s331_s10, %s414_s4 }
 0x25f   :  { %p337_p1 = pnand %p335_p0, %p332_p13 }
 0x261   :  { %340 = shalt.err (!%p337_p1)
}
 0x262   :  { %224 = dma.vmem_to_hbm [thread:$0]  %s222_s7, 128, %s414_s4, [#allocation4]  }
 0x263   :  { %343 = dma.done.wait [#allocation4], 128  }
 0x264   :  { %344 = vsyncadd [#allocation4], 4294967168 }
 0x265   :  { %228 = vsyncpa [#allocation3], 1 }
 0x266   :  { %229 = vsyncpa [#allocation4], 1 }

</bundles_post_ra>
